<compile_context>
chip_gen: v7x
topology: tpu7x:2x2x1
jax: 0.10.0
libtpu: 0.0.40
codegen_flags: <defaults>
</compile_context>

<pallas_src>
import jax
import jax.numpy as jnp
from jax.experimental import pallas as pl
from jax.experimental.pallas import tpu as pltpu


def _sigmoid(v):
    # Numerically stable sigmoid on the EUP (tanh): no inf intermediates,
    # bf16-safe.
    return 0.5 * (jnp.tanh(0.5 * v) + 1.0)


def dbf_kernel(x_ref, skip_ref, axt_ref, ast_ref, rx_ref, rs_ref,
               zx_ref, zs_ref, b_ref, out_ref):
    HW = x_ref.shape[2]

    # One packed group of nb batch elements: (rows, HW), rows = nb*C.
    # Load once, compute in f32 regardless of the I/O dtype.
    xf = x_ref[0].astype(jnp.float32)          # (rows, HW)
    sf = skip_ref[0].astype(jnp.float32)       # (rows, HW)

    # ---- global average pool (lane reductions, per packed row) -------------
    inv_hw = jnp.float32(1.0 / HW)
    px = jnp.sum(xf, axis=1, keepdims=True) * inv_hw        # (rows, 1)
    ps = jnp.sum(sf, axis=1, keepdims=True) * inv_hw        # (rows, 1)
    pcat = jnp.concatenate([px, ps], axis=0)                # (2*rows, 1)

    # ---- channel attention (block-diagonal over the packed batch) ----------
    # axt/ast hold W_att transposed ([in, out]) kron'd with I_nb; the matvec is
    # a tiny VPU multiply + sublane reduction -> lane-oriented (1, rows).
    attx = _sigmoid(jnp.sum(axt_ref[...] * pcat, axis=0, keepdims=True))
    atts = _sigmoid(jnp.sum(ast_ref[...] * pcat, axis=0, keepdims=True))

    # ---- fold the attention into the block-diagonal reduction weights ------
    rx_eff = rx_ref[...] * attx                              # (rows, rows)
    rs_eff = rs_ref[...] * atts                              # (rows, rows)

    # ---- channel reduction: two small MXU matmuls (no unrolled rank-1 loop) -
    acc = (jnp.dot(rx_eff, xf, preferred_element_type=jnp.float32)
           + jnp.dot(rs_eff, sf, preferred_element_type=jnp.float32))

    # ---- spatial attention: conv1(x)+conv2(skip)+bias -----------------------
    # Zx/Zs already replicate the 1-channel logits across each batch element's
    # C output rows (block-diagonal, every row of a block equals w1 / w2).
    z = (jnp.dot(zx_ref[...], xf, preferred_element_type=jnp.float32)
         + jnp.dot(zs_ref[...], sf, preferred_element_type=jnp.float32)
         + b_ref[0])

    # Single fused lane-dense store.
    out_ref[0] = (acc * _sigmoid(z)).astype(out_ref.dtype)


def _pack_factor(N, C, dtype):
    """How many batch elements to pack per grid step (rows = nb*C)."""
    packing = max(1, 4 // jnp.dtype(dtype).itemsize)   # 1 for f32, 2 for bf16
    sublane_rows = 8 * packing
    nb = max(1, sublane_rows // C) if C < sublane_rows else 1
    nb = min(nb, N)
    # Keep >= 2 parallel grid steps for v7x's two TensorCores when N allows.
    while nb > 1 and N // nb < 2:
        nb -= 1
    # nb must divide N evenly (no ragged last group at these sizes).
    while N % nb:
        nb -= 1
    return nb


def _blockdiag(block, nb):
    """kron(I_nb, block): block-diagonal replication over packed batches."""
    return jnp.kron(jnp.eye(nb, dtype=block.dtype), block)


def dbf_reference(x, skip, w_att, w_redu, w1, b1, w2, b2):
    """Pure-JAX reference mirroring the (intended) PyTorch forward, in f32."""
    x = x.astype(jnp.float32)
    skip = skip.astype(jnp.float32)
    C = x.shape[1]
    cat = jnp.concatenate([x, skip], axis=1)                         # (N,2C,H,W)
    pooled = jnp.mean(cat, axis=(2, 3), keepdims=True)               # (N,2C,1,1)
    att = jax.nn.sigmoid(
        jnp.einsum('oi,nihw->nohw', w_att.reshape(2 * C, 2 * C), pooled))
    out = cat * att
    out = jnp.einsum('oi,nihw->nohw', w_redu.reshape(C, 2 * C), out)
    a = (jnp.einsum('oi,nihw->nohw', w1.reshape(1, C), x) + b1.reshape(1, 1, 1, 1)
         + jnp.einsum('oi,nihw->nohw', w2.reshape(1, C), skip) + b2.reshape(1, 1, 1, 1))
    return out * jax.nn.sigmoid(a)


def dbf_forward(x, skip, w_att, w_redu, w1, b1, w2, b2, *, use_pallas=None):
    """x, skip: (N, C, H, W).  Output has the same dtype as x."""
    N, C, H, W = x.shape
    HW = H * W
    dtype = x.dtype

    if use_pallas is None:
        # Below ~1 MiB of activations the fused XLA path beats pallas_call's
        # fixed launch overhead; only engage the kernel above the threshold.
        use_pallas = 2 * N * C * HW * jnp.dtype(dtype).itemsize >= (1 << 20)
    if not use_pallas:
        return dbf_reference(x, skip, w_att, w_redu, w1, b1, w2, b2).astype(dtype)

    nb = _pack_factor(N, C, dtype)
    rows = nb * C
    G = N // nb

    # Pack nb consecutive batch elements into the sublane axis: (G, rows, HW).
    xf = x.reshape(G, rows, HW)
    sf = skip.reshape(G, rows, HW)

    f32 = jnp.float32
    Wa = w_att.reshape(2 * C, 2 * C).astype(f32)     # [out, in]
    Wr = w_redu.reshape(C, 2 * C).astype(f32)        # [out, in]
    w1r = w1.reshape(1, C).astype(f32)
    w2r = w2.reshape(1, C).astype(f32)

    # Block-diagonal weight matrices over the nb packed batch elements.
    axt = jnp.concatenate([_blockdiag(Wa[:C, :C].T, nb),
                           _blockdiag(Wa[:C, C:].T, nb)], axis=0)    # (2*rows, rows)
    ast = jnp.concatenate([_blockdiag(Wa[C:, :C].T, nb),
                           _blockdiag(Wa[C:, C:].T, nb)], axis=0)    # (2*rows, rows)
    rx = _blockdiag(Wr[:, :C], nb)                                   # (rows, rows)
    rs = _blockdiag(Wr[:, C:], nb)                                   # (rows, rows)
    zx = _blockdiag(jnp.tile(w1r, (C, 1)), nb)                       # (rows, rows)
    zs = _blockdiag(jnp.tile(w2r, (C, 1)), nb)                       # (rows, rows)
    bias = (b1 + b2).reshape(1).astype(f32)          # out_channels == 1 => scalar

    # Resident (non-pipelined) weights: full-array VMEM specs, no per-step DMA.
    vmem_full = pl.BlockSpec(memory_space=pltpu.MemorySpace.VMEM)
    smem_full = pl.BlockSpec(memory_space=pltpu.MemorySpace.SMEM)

    compiler_kwargs = dict(dimension_semantics=("parallel",))
    block_bytes = rows * HW * jnp.dtype(dtype).itemsize
    vmem_need = 3 * 2 * block_bytes + 8 * (2 * rows) * rows * 4
    if vmem_need > 24 * 1024 * 1024:
        # Raise the default scoped limit but stay under v7x's 64 MiB physical.
        # TODO(synk): beyond this, tile HW with a pooled-sum pre-pass instead.
        compiler_kwargs["vmem_limit_bytes"] = min(int(1.5 * vmem_need),
                                                  60 * 1024 * 1024)

    out = pl.pallas_call(
        dbf_kernel,
        out_shape=jax.ShapeDtypeStruct((G, rows, HW), dtype),
        grid=(G,),
        in_specs=[
            pl.BlockSpec((1, rows, HW), lambda g: (g, 0, 0)),   # x (packed)
            pl.BlockSpec((1, rows, HW), lambda g: (g, 0, 0)),   # skip (packed)
            vmem_full,                                          # W_att^T (x half)
            vmem_full,                                          # W_att^T (skip half)
            vmem_full,                                          # W_redu (x half)
            vmem_full,                                          # W_redu (skip half)
            vmem_full,                                          # conv1 rows
            vmem_full,                                          # conv2 rows
            smem_full,                                          # bias scalar
        ],
        out_specs=pl.BlockSpec((1, rows, HW), lambda g: (g, 0, 0)),
        compiler_params=pltpu.CompilerParams(**compiler_kwargs),
    )(xf, sf, axt, ast, rx, rs, zx, zs, bias)
    return out.reshape(N, C, H, W)


if __name__ == "__main__":
    dim, N, H, W = 4, 4, 16, 16

    key = jax.random.PRNGKey(0)
    k = jax.random.split(key, 8)
    x = jax.random.normal(k[0], (N, dim, H, W), jnp.float32)
    skip = jax.random.normal(k[1], (N, dim, H, W), jnp.float32)

    # deterministic parameter init (shapes follow the PyTorch module __init__)
    w_att = jax.random.normal(k[2], (2 * dim, 2 * dim, 1, 1), jnp.float32) * 0.2
    w_redu = jax.random.normal(k[3], (dim, 2 * dim, 1, 1), jnp.float32) * 0.2
    w1 = jax.random.normal(k[4], (1, dim, 1, 1), jnp.float32) * 0.2
    b1 = jax.random.normal(k[5], (1,), jnp.float32) * 0.1
    w2 = jax.random.normal(k[6], (1, dim, 1, 1), jnp.float32) * 0.2
    b2 = jax.random.normal(k[7], (1,), jnp.float32) * 0.1

    # ---- f32 I/O (module default): exact correctness check -----------------
    out = jax.block_until_ready(
        dbf_forward(x, skip, w_att, w_redu, w1, b1, w2, b2, use_pallas=True))
    ref = dbf_reference(x, skip, w_att, w_redu, w1, b1, w2, b2)
    assert out.shape == (N, dim, H, W)
    assert jnp.allclose(out, ref, atol=1e-4, rtol=1e-4), \
        f"f32 max abs err {jnp.max(jnp.abs(out - ref))}"

    # ---- bf16 I/O (halves HBM traffic); compute stays f32 -------------------
    x_bf = x.astype(jnp.bfloat16)
    s_bf = skip.astype(jnp.bfloat16)
    out_bf = jax.block_until_ready(
        dbf_forward(x_bf, s_bf, w_att, w_redu, w1, b1, w2, b2, use_pallas=True))
    ref_bf = dbf_reference(x_bf, s_bf, w_att, w_redu, w1, b1, w2, b2)
    assert out_bf.dtype == jnp.bfloat16
    assert jnp.allclose(out_bf.astype(jnp.float32), ref_bf, atol=3e-2, rtol=3e-2), \
        f"bf16 max abs err {jnp.max(jnp.abs(out_bf.astype(jnp.float32) - ref_bf))}"

    print("KERNEL_OK")
</pallas_src>

<mosaic_0001>
module attributes {stable_mosaic.version = 11 : i64} {
  func.func @dbf_kernel(%arg0: i32, %arg1: memref<1x8x256xf32, #tpu.memory_space<vmem>>, %arg2: memref<1x8x256xf32, #tpu.memory_space<vmem>>, %arg3: memref<16x8xf32, #tpu.memory_space<vmem>>, %arg4: memref<16x8xf32, #tpu.memory_space<vmem>>, %arg5: memref<8x8xf32, #tpu.memory_space<vmem>>, %arg6: memref<8x8xf32, #tpu.memory_space<vmem>>, %arg7: memref<8x8xf32, #tpu.memory_space<vmem>>, %arg8: memref<8x8xf32, #tpu.memory_space<vmem>>, %arg9: memref<1xf32, #tpu.memory_space<smem>>, %arg10: memref<1x8x256xf32, #tpu.memory_space<vmem>>) attributes {dimension_semantics = [#tpu.dimension_semantics<parallel>], iteration_bounds = array<i64: 2>, scalar_prefetch = 0 : i64, scratch_operands = 0 : i64, tpu.core_type = #tpu.core_type<tc>, window_params = [{transform_indices = @transform_0, window_bounds = array<i64: 1, 8, 256>}, {transform_indices = @transform_1, window_bounds = array<i64: 1, 8, 256>}, {pipeline_mode = #tpu.pipeline_mode<synchronous>, transform_indices = @transform_2, window_bounds = array<i64: 16, 8>}, {pipeline_mode = #tpu.pipeline_mode<synchronous>, transform_indices = @transform_3, window_bounds = array<i64: 16, 8>}, {pipeline_mode = #tpu.pipeline_mode<synchronous>, transform_indices = @transform_4, window_bounds = array<i64: 8, 8>}, {pipeline_mode = #tpu.pipeline_mode<synchronous>, transform_indices = @transform_5, window_bounds = array<i64: 8, 8>}, {pipeline_mode = #tpu.pipeline_mode<synchronous>, transform_indices = @transform_6, window_bounds = array<i64: 8, 8>}, {pipeline_mode = #tpu.pipeline_mode<synchronous>, transform_indices = @transform_7, window_bounds = array<i64: 8, 8>}, {transform_indices = @transform_8, window_bounds = array<i64: 1>}, {transform_indices = @transform_9, window_bounds = array<i64: 1, 8, 256>}]} {
    %c0 = arith.constant 0 : index
    %c0_0 = arith.constant 0 : index
    %c0_1 = arith.constant 0 : index
    %0 = vector.load %arg1[%c0, %c0_0, %c0_1] : memref<1x8x256xf32, #tpu.memory_space<vmem>>, vector<1x8x256xf32>
    %1 = vector.shape_cast %0 : vector<1x8x256xf32> to vector<8x256xf32>
    %c0_2 = arith.constant 0 : index
    %c0_3 = arith.constant 0 : index
    %c0_4 = arith.constant 0 : index
    %2 = vector.load %arg2[%c0_2, %c0_3, %c0_4] : memref<1x8x256xf32, #tpu.memory_space<vmem>>, vector<1x8x256xf32>
    %3 = vector.shape_cast %2 : vector<1x8x256xf32> to vector<8x256xf32>
    %cst = arith.constant dense<0.000000e+00> : vector<8xf32>
    %4 = vector.multi_reduction <add>, %1, %cst [1] : vector<8x256xf32> to vector<8xf32>
    %5 = vector.shape_cast %4 : vector<8xf32> to vector<8x1xf32>
    %cst_5 = arith.constant 3.906250e-03 : f32
    %6 = vector.broadcast %cst_5 : f32 to vector<8x1xf32>
    %7 = arith.mulf %5, %6 : vector<8x1xf32>
    %cst_6 = arith.constant dense<0.000000e+00> : vector<8xf32>
    %8 = vector.multi_reduction <add>, %3, %cst_6 [1] : vector<8x256xf32> to vector<8xf32>
    %9 = vector.shape_cast %8 : vector<8xf32> to vector<8x1xf32>
    %cst_7 = arith.constant 3.906250e-03 : f32
    %10 = vector.broadcast %cst_7 : f32 to vector<8x1xf32>
    %11 = arith.mulf %9, %10 : vector<8x1xf32>
    %12 = tpu.concatenate %7, %11 in 0 : vector<8x1xf32>, vector<8x1xf32> -> vector<16x1xf32>
    %c0_8 = arith.constant 0 : index
    %c0_9 = arith.constant 0 : index
    %13 = vector.load %arg3[%c0_8, %c0_9] : memref<16x8xf32, #tpu.memory_space<vmem>>, vector<16x8xf32>
    %14 = vector.broadcast %12 : vector<16x1xf32> to vector<16x8xf32>
    %15 = arith.mulf %13, %14 : vector<16x8xf32>
    %cst_10 = arith.constant dense<0.000000e+00> : vector<8xf32>
    %16 = vector.multi_reduction <add>, %15, %cst_10 [0] : vector<16x8xf32> to vector<8xf32>
    %17 = vector.shape_cast %16 : vector<8xf32> to vector<1x8xf32>
    %cst_11 = arith.constant 5.000000e-01 : f32
    %18 = vector.broadcast %cst_11 : f32 to vector<1x8xf32>
    %19 = arith.mulf %18, %17 : vector<1x8xf32>
    %20 = math.tanh %19 : vector<1x8xf32>
    %cst_12 = arith.constant 1.000000e+00 : f32
    %21 = vector.broadcast %cst_12 : f32 to vector<1x8xf32>
    %22 = arith.addf %20, %21 : vector<1x8xf32>
    %cst_13 = arith.constant 5.000000e-01 : f32
    %23 = vector.broadcast %cst_13 : f32 to vector<1x8xf32>
    %24 = arith.mulf %23, %22 : vector<1x8xf32>
    %c0_14 = arith.constant 0 : index
    %c0_15 = arith.constant 0 : index
    %25 = vector.load %arg4[%c0_14, %c0_15] : memref<16x8xf32, #tpu.memory_space<vmem>>, vector<16x8xf32>
    %26 = vector.broadcast %12 : vector<16x1xf32> to vector<16x8xf32>
    %27 = arith.mulf %25, %26 : vector<16x8xf32>
    %cst_16 = arith.constant dense<0.000000e+00> : vector<8xf32>
    %28 = vector.multi_reduction <add>, %27, %cst_16 [0] : vector<16x8xf32> to vector<8xf32>
    %29 = vector.shape_cast %28 : vector<8xf32> to vector<1x8xf32>
    %cst_17 = arith.constant 5.000000e-01 : f32
    %30 = vector.broadcast %cst_17 : f32 to vector<1x8xf32>
    %31 = arith.mulf %30, %29 : vector<1x8xf32>
    %32 = math.tanh %31 : vector<1x8xf32>
    %cst_18 = arith.constant 1.000000e+00 : f32
    %33 = vector.broadcast %cst_18 : f32 to vector<1x8xf32>
    %34 = arith.addf %32, %33 : vector<1x8xf32>
    %cst_19 = arith.constant 5.000000e-01 : f32
    %35 = vector.broadcast %cst_19 : f32 to vector<1x8xf32>
    %36 = arith.mulf %35, %34 : vector<1x8xf32>
    %c0_20 = arith.constant 0 : index
    %c0_21 = arith.constant 0 : index
    %37 = vector.load %arg5[%c0_20, %c0_21] : memref<8x8xf32, #tpu.memory_space<vmem>>, vector<8x8xf32>
    %38 = vector.broadcast %24 : vector<1x8xf32> to vector<8x8xf32>
    %39 = arith.mulf %37, %38 : vector<8x8xf32>
    %c0_22 = arith.constant 0 : index
    %c0_23 = arith.constant 0 : index
    %40 = vector.load %arg6[%c0_22, %c0_23] : memref<8x8xf32, #tpu.memory_space<vmem>>, vector<8x8xf32>
    %41 = vector.broadcast %36 : vector<1x8xf32> to vector<8x8xf32>
    %42 = arith.mulf %40, %41 : vector<8x8xf32>
    %cst_24 = arith.constant dense<0.000000e+00> : vector<8x256xf32>
    %43 = tpu.matmul %39, %1, %cst_24 {dimension_numbers = #tpu.dot_dimension_numbers<[1], [0], [0], [1], [0, 0, 1, 1], [], []>} : vector<8x8xf32>, vector<8x256xf32>, vector<8x256xf32> -> vector<8x256xf32>
    %cst_25 = arith.constant dense<0.000000e+00> : vector<8x256xf32>
    %44 = tpu.matmul %42, %3, %cst_25 {dimension_numbers = #tpu.dot_dimension_numbers<[1], [0], [0], [1], [0, 0, 1, 1], [], []>} : vector<8x8xf32>, vector<8x256xf32>, vector<8x256xf32> -> vector<8x256xf32>
    %45 = arith.addf %43, %44 : vector<8x256xf32>
    %c0_26 = arith.constant 0 : index
    %c0_27 = arith.constant 0 : index
    %46 = vector.load %arg7[%c0_26, %c0_27] : memref<8x8xf32, #tpu.memory_space<vmem>>, vector<8x8xf32>
    %cst_28 = arith.constant dense<0.000000e+00> : vector<8x256xf32>
    %47 = tpu.matmul %46, %1, %cst_28 {dimension_numbers = #tpu.dot_dimension_numbers<[1], [0], [0], [1], [0, 0, 1, 1], [], []>} : vector<8x8xf32>, vector<8x256xf32>, vector<8x256xf32> -> vector<8x256xf32>
    %c0_29 = arith.constant 0 : index
    %c0_30 = arith.constant 0 : index
    %48 = vector.load %arg8[%c0_29, %c0_30] : memref<8x8xf32, #tpu.memory_space<vmem>>, vector<8x8xf32>
    %cst_31 = arith.constant dense<0.000000e+00> : vector<8x256xf32>
    %49 = tpu.matmul %48, %3, %cst_31 {dimension_numbers = #tpu.dot_dimension_numbers<[1], [0], [0], [1], [0, 0, 1, 1], [], []>} : vector<8x8xf32>, vector<8x256xf32>, vector<8x256xf32> -> vector<8x256xf32>
    %50 = arith.addf %47, %49 : vector<8x256xf32>
    %c0_32 = arith.constant 0 : index
    %51 = memref.load %arg9[%c0_32] : memref<1xf32, #tpu.memory_space<smem>>
    %52 = vector.broadcast %51 : f32 to vector<8x256xf32>
    %53 = arith.addf %50, %52 : vector<8x256xf32>
    %cst_33 = arith.constant 5.000000e-01 : f32
    %54 = vector.broadcast %cst_33 : f32 to vector<8x256xf32>
    %55 = arith.mulf %54, %53 : vector<8x256xf32>
    %56 = math.tanh %55 : vector<8x256xf32>
    %cst_34 = arith.constant 1.000000e+00 : f32
    %57 = vector.broadcast %cst_34 : f32 to vector<8x256xf32>
    %58 = arith.addf %56, %57 : vector<8x256xf32>
    %cst_35 = arith.constant 5.000000e-01 : f32
    %59 = vector.broadcast %cst_35 : f32 to vector<8x256xf32>
    %60 = arith.mulf %59, %58 : vector<8x256xf32>
    %61 = arith.mulf %45, %60 : vector<8x256xf32>
    %c0_36 = arith.constant 0 : index
    %c0_37 = arith.constant 0 : index
    %c0_38 = arith.constant 0 : index
    %62 = vector.load %arg10[%c0_36, %c0_37, %c0_38] : memref<1x8x256xf32, #tpu.memory_space<vmem>>, vector<1x8x256xf32>
    %63 = vector.shape_cast %62 : vector<1x8x256xf32> to vector<8x256xf32>
    %64 = vector.shape_cast %61 : vector<8x256xf32> to vector<1x8x256xf32>
    tpu.vector_store %arg10[%c0_36, %c0_37, %c0_38], %64 {strides = array<i32>} : memref<1x8x256xf32, #tpu.memory_space<vmem>>, vector<1x8x256xf32>,
    return
  }
  func.func @transform_0(%arg0: i32) -> (i32, i32, i32) {
    %c0_i32 = arith.constant 0 : i32
    %c0_i32_0 = arith.constant 0 : i32
    %c0_i32_1 = arith.constant 0 : i32
    return %arg0, %c0_i32, %c0_i32_0 : i32, i32, i32
  }
  func.func @transform_1(%arg0: i32) -> (i32, i32, i32) {
    %c0_i32 = arith.constant 0 : i32
    %c0_i32_0 = arith.constant 0 : i32
    %c0_i32_1 = arith.constant 0 : i32
    return %arg0, %c0_i32, %c0_i32_0 : i32, i32, i32
  }
  func.func @transform_2(%arg0: i32) -> (i32, i32) {
    %c0_i32 = arith.constant 0 : i32
    %c0_i32_0 = arith.constant 0 : i32
    %c0_i32_1 = arith.constant 0 : i32
    return %c0_i32, %c0_i32_0 : i32, i32
  }
  func.func @transform_3(%arg0: i32) -> (i32, i32) {
    %c0_i32 = arith.constant 0 : i32
    %c0_i32_0 = arith.constant 0 : i32
    %c0_i32_1 = arith.constant 0 : i32
    return %c0_i32, %c0_i32_0 : i32, i32
  }
  func.func @transform_4(%arg0: i32) -> (i32, i32) {
    %c0_i32 = arith.constant 0 : i32
    %c0_i32_0 = arith.constant 0 : i32
    %c0_i32_1 = arith.constant 0 : i32
    return %c0_i32, %c0_i32_0 : i32, i32
  }
  func.func @transform_5(%arg0: i32) -> (i32, i32) {
    %c0_i32 = arith.constant 0 : i32
    %c0_i32_0 = arith.constant 0 : i32
    %c0_i32_1 = arith.constant 0 : i32
    return %c0_i32, %c0_i32_0 : i32, i32
  }
  func.func @transform_6(%arg0: i32) -> (i32, i32) {
    %c0_i32 = arith.constant 0 : i32
    %c0_i32_0 = arith.constant 0 : i32
    %c0_i32_1 = arith.constant 0 : i32
    return %c0_i32, %c0_i32_0 : i32, i32
  }
  func.func @transform_7(%arg0: i32) -> (i32, i32) {
    %c0_i32 = arith.constant 0 : i32
    %c0_i32_0 = arith.constant 0 : i32
    %c0_i32_1 = arith.constant 0 : i32
    return %c0_i32, %c0_i32_0 : i32, i32
  }
  func.func @transform_8(%arg0: i32) -> i32 {
    %c0_i32 = arith.constant 0 : i32
    %c0_i32_0 = arith.constant 0 : i32
    return %c0_i32 : i32
  }
  func.func @transform_9(%arg0: i32) -> (i32, i32, i32) {
    %c0_i32 = arith.constant 0 : i32
    %c0_i32_0 = arith.constant 0 : i32
    %c0_i32_1 = arith.constant 0 : i32
    return %arg0, %c0_i32, %c0_i32_0 : i32, i32, i32
  }
}

</mosaic_0001>

<bundles_post_ra>
// kernel: tpu_custom_call.1
= control target key start
LH: loop header
LB: loop body
LE: loop exit
PB: predicated region body
PF: predicated region fallthrough
CT: control target
= control target key end

     0   :  { %s1395_s0 = inlined_call_operand.vmem [shape: f32[2,8,256], index: 0, kind: input, shape index: {}]   ;;  %s1396_s1 = inlined_call_operand.hbm [shape: f32[2,8,256], index: 1, kind: input, shape index: {}]   ;;  %s1397_s2 = inlined_call_operand.vmem [shape: f32[16,8], index: 2, kind: input, shape index: {}]   ;;  %s1398_s3 = inlined_call_operand.vmem [shape: f32[16,8], index: 3, kind: input, shape index: {}]   ;;  %s1399_s4 = inlined_call_operand.vmem [shape: f32[8,8], index: 4, kind: input, shape index: {}]   ;;  %s1400_s5 = inlined_call_operand.vmem [shape: f32[8,8], index: 5, kind: input, shape index: {}]   ;;  %s1401_s6 = inlined_call_operand.vmem [shape: f32[8,8], index: 6, kind: input, shape index: {}]   ;;  %s1402_s7 = inlined_call_operand.hbm [shape: f32[8,8], index: 7, kind: input, shape index: {}]   ;;  %s1403_s8 = inlined_call_operand.<no memory space> [shape: f32[1], index: 8, kind: input, shape index: {}]   ;;  %s1404_s9 = inlined_call_operand.hbm [shape: f32[2,8,256], index: 9, kind: output, shape index: {}]  }
   0x1   :  { %14 = sst [smem:[#allocation2]] %s1403_s8 }
   0x2   :  { %15 = vsyncpa [#allocation4], 0 }
   0x3   :  { %17 = vsyncpa [#allocation4 + $0x1], 0 }
   0x4   :  { %18 = vsyncpa [#allocation7], 0 }
   0x5   :  { %19 = vsyncpa [#allocation5], 0 }
   0x6   :  { %21 = vsyncpa [#allocation5 + $0x1], 0  ;;  %s1151_s11 = smov 0   ;;  %s1153_s12 = smov 0  }
   0x7   :  { %s1155_s13 = smov 0   ;;  %s1157_s14 = smov 0  }
   0x8 LB: > { %s1172_s8 = sadd.s32 4294967295, %s1091_s14   ;;  %s865_s15 = sadd.s32 4294967294, %s1091_s14   ;;  %s1091_s14 = sphi %s1157_s14, %s1428_s14   ;;  %s1087_s13 = sphi %s1155_s13, %s1427_s13   ;;  %s1083_s12 = sphi %s1153_s12, %s1426_s12   ;;  %s1079_s11 = sphi %s1151_s11, %s1425_s11  }
   0x9   : > { %p73_p0 = scmp.ne.s32.totalorder %s1083_s12, %s1079_s11  ;;  %p1405_p1 = scmp.eq.s32.totalorder %s1172_s8, 0 }
   0xa   : > { %p250_p3 = scmp.eq.s32.totalorder %s865_s15, 1  ;;  %p866_p5 = scmp.ge.s32.totalorder %s1091_s14, 1 }
   0xb   : > { %p1181_p4 = por %p1405_p1, %p73_p0  ;;  %p257_p7 = scmp.lt.s32.totalorder %s1091_s14, 3 }
   0xc   : > { %p1186_p6 = por %p250_p3, %p73_p0  ;;  %s1093_s19 = smov [#allocation6]  }
   0xd   : > { %s1408_s16 = scalar_select %p1181_p4, 1, 0 }
   0xe   : > { %s1409_s17 = scalar_select %p1186_p6, 1, 0 }
   0xf   : > { %p1191_p8 = pnand %p866_p5, %p257_p7  ;;  %s285_s20 = sshll.u32 %s1093_s19, 4  ;;  %s286_s20 = int_to_ptr.vmem [resolvable:$true] %s285_s20 }
  0x10   : > { %s1199_s21 = sadd.s32 1, %s1091_s14   ;;  %s60_s25 = sadd.s32 1, %s1087_s13 }
  0x11   : > { %s1410_s18 = scalar_select %p1191_p8, 1, 0 }
  0x12   : > { %p902_p10 = pneg %p1191_p8  ;;  %s57_s23 = ssub.s32 %s1091_s14, %s1199_s21 }
  0x13   : > { %p1209_p12 = scmp.eq.s32.totalorder %s57_s23, 0  ;;  %s963_s28 = scalar_lea.hbm %s1402_s7, 128 }
  0x14   : > { %p1203_p11 = pnand %p902_p10, %p1405_p1  ;;  %p964_p0 = scmp.ne.s32.totalorder %s1402_s7, %s963_s28 }
  0x15   : > { %s1412_s24 = scalar_select %p1209_p12, 1, 0 }
  0x16   : > { %p965_p3 = pneg %p1203_p11  ;;  %p970_p10 = scmp.lt.u32.totalorder %s963_s28, %s1402_s7 }
  0x18   : > { %p966_p5 = pnand %p965_p3, %p964_p0 }
  0x1a   : > { %p967_p7 = pneg %p966_p5 }
  0x1c   : > { %p972_p9 = pnand %p970_p10, %p967_p7 }
  0x1e   : > { %975 = shalt.err (!%p972_p9)
}
  0x1f   : > { %s976_s19 = scalar_lea.vmem %s286_s20, 128  ;;  %p984_p6 = scmp.lt.s32.totalorder %s286_s20, %s286_s20 }
  0x20   : > { %p977_p1 = scmp.ne.s32.totalorder %s286_s20, %s976_s19  ;;  %p985_p4 = scmp.lt.s32.totalorder %s976_s19, %s976_s19 }
  0x22   : > { %p979_p2 = pnand %p977_p1, %p965_p3  ;;  %p986_p8 = por %p985_p4, %p984_p6 }
  0x24   : > { %p980_p13 = pneg %p979_p2 }
  0x26   : > { %p987_p12 = pnand %p986_p8, %p980_p13 }
  0x28   : > { %990 = shalt.err (!%p987_p12)
}
  0x29   : > { %905 = dma.hbm_to_vmem [thread:$0]  (!%p1203_p11), %s1402_s7, 128, %s286_s20, [#allocation7]  }
  0x2a   : > { %p1413_p1 = scmp.ne.s32.totalorder %s1412_s24, 0  ;;  %p68_p2 = scmp.eq.s32.totalorder %s1091_s14, 0 }
  0x2b   : > { %p1414_p4 = scmp.ne.s32.totalorder %s1087_s13, %s1083_s12  ;;  %p1415_p6 = scmp.eq.s32.totalorder %s1172_s8, 1 }
  0x2c   : > { %s1235_s27 = scalar_select %p1413_p1, %s1087_s13, %s60_s25  }
  0x2d   : > { %p1243_p8 = por %p1415_p6, %p1414_p4  ;;  %p915_p9 = scmp.lt.s32.totalorder %s1091_s14, 2 }
  0x2e   : > { %s307_s28 = sand.u32 1, %s1087_s13   ;;  %p1417_p12 = pmov %p1414_p4 }
  0x2f   : > { %s869_s29 = sshll.u32 %s307_s28, 4  ;;  %s887_s30 = sshll.u32 %s1091_s14, 8 }
  0x30   : > { %p69_p13 = por %p68_p2, %p1417_p12  ;;  %s1256_s20 = scalar_lea.hbm %s1396_s1, %s887_s30 }
  0x31   : > { %s311_s24 = scalar_lea.vmem [#allocation3], %s869_s29  ;;  %s308_s23 = scalar_lea.sflag [#allocation4], %s307_s28 }
  0x32   : > { %s319_s25 = sshll.u32 %s311_s24, 4  ;;  %p1258_p11 = pnand %p915_p9, %p69_p13  ;;  %s1262_s25 = int_to_ptr.vmem [resolvable:$true] %s319_s25 }
  0x33   : > { %s991_s26 = scalar_lea.hbm %s1256_s20, 256  ;;  %s996_s10 = scalar_lea.hbm %s1396_s1, 512 }
  0x34   : > { %p992_p0 = scmp.ne.s32.totalorder %s1256_s20, %s991_s26  ;;  %p993_p3 = pneg %p1258_p11 }
  0x35   : > { %p997_p10 = scmp.lt.u32.totalorder %s1256_s20, %s1396_s1  ;;  %p998_p1 = scmp.lt.u32.totalorder %s996_s10, %s991_s26 }
  0x36   : > { %p994_p5 = pnand %p993_p3, %p992_p0  ;;  %p1000_p4 = scmp.lt.u32.totalorder %s991_s26, %s1256_s20 }
  0x37   : > { %p999_p2 = por %p998_p1, %p997_p10 }
  0x38   : > { %p995_p7 = pneg %p994_p5 }
  0x39   : > { %p1001_p6 = por %p1000_p4, %p999_p2 }
  0x3b   : > { %p1002_p9 = pnand %p1001_p6, %p995_p7 }
  0x3d   : > { %1005 = shalt.err (!%p1002_p9)
}
  0x3e   : > { %s1006_s28 = scalar_lea.vmem %s1262_s25, 256  ;;  %s1094_s30 = smov [#allocation3]  }
  0x3f   : > { %p1007_p12 = scmp.ne.s32.totalorder %s1262_s25, %s1006_s28  ;;  %s1011_s29 = sshll.u32 %s1094_s30, 4  ;;  %s1012_s29 = int_to_ptr.vmem [resolvable:$false] %s1011_s29 }
  0x40   : > { %s1013_s15 = scalar_lea.vmem %s1012_s29, 512  ;;  %p1014_p5 = scmp.lt.s32.totalorder %s1262_s25, %s1012_s29 }
  0x41   : > { %p1009_p13 = pnand %p1007_p12, %p993_p3  ;;  %p1015_p10 = scmp.lt.s32.totalorder %s1013_s15, %s1006_s28 }
  0x43   : > { %p1010_p0 = pneg %p1009_p13  ;;  %p1016_p1 = por %p1015_p10, %p1014_p5 }
  0x45   : > { %p1017_p2 = pnand %p1016_p1, %p1010_p0 }
  0x47   : > { %1020 = shalt.err (!%p1017_p2)
}
  0x48   : > { %909 = dma.hbm_to_vmem [thread:$0]  (!%p1258_p11), %s1256_s20, 256, %s1262_s25, %s308_s23  }
  0x49   : > { %p1419_p7 = scmp.ne.s32.totalorder %s1410_s18, 0 }
  0x4a   : > { %s1292_s26 = sand.u32 (!%p1419_p7), 1, %s1083_s12   ;;  %p1420_p3 = scmp.ne.s32.totalorder (!%p1419_p7), %s1408_s16, 0 }
  0x4b   : > { %328 = sbr.rel (%p1419_p7) target bundleno = 644 (0x284), region = 56  ;;  %s873_s10 = sshll.u32 (!%p1419_p7), %s1292_s26, 4 }
  0x4c   : > { %s331_s24 = scalar_lea.sflag (!%p1419_p7), [#allocation4], %s1292_s26  ;;  %s334_s28 = scalar_lea.vmem (!%p1419_p7), [#allocation3], %s873_s10 }
  0x52   : > { %1066 = dma.done.wait (%p1420_p3), %s331_s24, 256  }
  0x53   : > { %1068 = vsyncadd (%p1420_p3), %s331_s24, 4294967040  ;;  %p1421_p11 = scmp.eq.s32.totalorder %s1172_s8, 0 }
  0x55   : > { %1070 = dma.done.wait (%p1421_p11), [#allocation7], 128   ;;  %p1422_p4 = pmov %p1421_p11 }
  0x56   : > { %p378_p6 = scmp.lt.s32.totalorder %s1172_s8, 1  ;;  %v385_v2 = vld [vmem:[%s334_s28] sm:$0xff]  ;;  %v386_v4 = vld [vmem:[%s334_s28 + $0x8] sm:$0xff]  ;;  %v1095_v6 = vmov 0   ;;  %vm409_vm0 = vcmask 64512   ;;  %v1096_v11 = vmov 0.0  }
  0x57   : > { %1072 = vsyncadd (%p1422_p4), [#allocation7], 4294967168  ;;  %597 = vmatprep.subr.mxu1 %v386_v4  ;;  %447 = vmatprep.subr.mxu0 %v386_v4  ;;  %v391_v5 = vadd.f32 %v386_v4, %v385_v2  ;;  %v593_v12 = vld [vmem:[#allocation6] sm:$0xff]  ;;  %v396_v17 = vld [vmem:[%s1397_s2 + $0x8] sm:$0xff]  ;;  %s742_s15 = sld [smem:[#allocation2]]  ;;  %s889_s24 = sshll.u32 %s1172_s8, 8 }
  0x58   : > { %s379_s18 = scalar_select %p378_p6, %s1172_s8, 1  ;;  %598 = vmatpush1.msra.mxu1 %v385_v2  ;;  %448 = vmatpush1.msra.mxu0 %v385_v2  ;;  %v592_v13 = vld [vmem:[%s1401_s6] sm:$0xff]  ;;  %v424_v18 = vld [vmem:[%s1398_s3 + $0x8] sm:$0xff] }
  0x59   : > { %953 = vset.pattern.permute.xlu1 %v1095_v6  ;;  %954 = vset.pattern.permute.xlu0 %v1095_v6  ;;  %v395_v14 = vld [vmem:[%s1397_s2] sm:$0xff]  ;;  %s377_s28 = scalar_lea.vmem [#allocation8], %s873_s10  ;;  %s1351_s19 = scalar_lea.hbm %s1404_s9, %s889_s24 }
  0x5a   : > { %s888_s20 = sshll.u32 %s379_s18, 4  ;;  %661 = vmatprep.mubr.f32.mxu1 %v1096_v11  ;;  %511 = vmatprep.mubr.f32.mxu0 %v1096_v11  ;;  %v423_v15 = vld [vmem:[%s1398_s3] sm:$0xff]  ;;  %s773_s18 = sshll.u32 %s377_s28, 4  ;;  %s1353_s18 = int_to_ptr.vmem [resolvable:$true] %s773_s18 }
  0x5b   : > { %s382_s23 = scalar_lea.vmem %s1395_s0, %s888_s20  ;;  %880 = vmatmul.mubr.msk.f32.vlgmr.msra.gmra.mrb[0].mxu1 %vm409_vm0, %v593_v12  ;;  %v442_v47 = vld [vmem:[%s1400_s5] sm:$0xff]  ;;  %s759_s8 = scalar_lea.sflag [#allocation5], %s1292_s26 }
  0x5c   : > { %v1311_v0 = vld [vmem:[%s382_s23] sm:$0xff]  ;;  %v384_v1 = vld [vmem:[%s382_s23 + $0x8] sm:$0xff]  ;;  %735 = vmatprep.mubr.f32.mxu1 %v1096_v11  ;;  %s1021_s10 = scalar_lea.vmem %s1353_s18, 256  ;;  %s1097_s23 = smov [#allocation8]  }
  0x5d   : > { %v387_v3 = vadd.f32 %v384_v1, %v1311_v0  ;;  %671 = vmatprep.subr.mxu1 %v384_v1  ;;  %521 = vmatprep.subr.mxu0 %v384_v1  ;;  %v440_v52 = vld [vmem:[%s1399_s4] sm:$0xff]  ;;  %v743_v56 = vstv %s742_s15  ;;  %p1022_p9 = scmp.ne.s32.totalorder %s1353_s18, %s1021_s10  ;;  %s1025_s16 = sshll.u32 %s1097_s23, 4  ;;  %s1026_s16 = int_to_ptr.vmem [resolvable:$false] %s1025_s16 }
  0x5e   : > { %672 = vmatpush1.msra.mxu1 %v1311_v0  ;;  %s1027_s30 = scalar_lea.vmem %s1026_s16, 512  ;;  %p1028_p0 = scmp.lt.s32.totalorder %s1353_s18, %s1026_s16 }
  0x5f   : > { %388 = vadd.xlane.f32.xlu0 %v387_v3  ;;  %p1023_p12 = pnand %p1022_p9, %p1243_p8  ;;  %p1029_p5 = scmp.lt.s32.totalorder %s1027_s30, %s1021_s10 }
  0x61   : > { %p1024_p13 = pneg %p1023_p12  ;;  %p1030_p10 = por %p1029_p5, %p1028_p0 }
  0x63   : > { %392 = vadd.xlane.f32.xlu0 %v391_v5  ;;  %881 = vmatmul.mubr.msk.f32.vlgmr.msra.gmra.mrb[0].mxu1 %vm409_vm0, %v592_v13  ;;  %p1031_p1 = pnand %p1030_p10, %p1024_p13 }
  0xec   : > { %v389_v7 = vpop.xlane.xlu0 %388 }
  0xed   : > { %v390_v8 = vmul.f32 0.00390625, %v389_v7 }
  0xef   : > { %399 = vperm.xlu1 %953, %v390_v8  }
  0xf0   : > { %v393_v9 = vpop.xlane.xlu0 %392 }
  0xf1   : > { %v394_v10 = vmul.f32 0.00390625, %v393_v9 }
  0xf3   : > { %404 = vperm.xlu1 %953, %v394_v10  }
 0x136   : > { %v737_v54 = vpop.f32.mrb[0].mxu1 }
 0x137   : > { %v739_v55 = vpop.f32.mrb[1].mxu1  ;;  %v744_v57 = vadd.f32 %v743_v56, %v737_v54 }
 0x138   : > { %v745_v58 = vadd.f32 %v743_v56, %v739_v55 }
 0x139   : > { %v746_v59 = vmul.f32 0.5, %v744_v57 }
 0x13a   : > { %v747_v60 = vmul.f32 0.5, %v745_v58 }
 0x16e   : > { %v400_v16 = vpop.permute.xlu1 %399 }
 0x16f   : > { %v407_v19 = vmul.f32 %v400_v16, %v395_v14  ;;  %v425_v20 = vmul.f32 %v423_v15, %v400_v16 }
 0x171   : > { %v410_v24 = vsel %vm409_vm0, %v407_v19, 0.0  ;;  %v427_v25 = vsel %vm409_vm0, %v425_v20, 0.0 }
 0x172   : > { %v405_v21 = vpop.permute.xlu1 %404 }
 0x173   : > { %v408_v22 = vmul.f32 %v405_v21, %v396_v17  ;;  %v426_v23 = vmul.f32 %v424_v18, %v405_v21 }
 0x175   : > { %v411_v26 = vsel %vm409_vm0, %v408_v22, 0.0  ;;  %v428_v27 = vsel %vm409_vm0, %v426_v23, 0.0 }
 0x176   : > { %v412_v28 = vadd.f32 %v411_v26, %v410_v24  ;;  %v429_v29 = vadd.f32 %v428_v27, %v427_v25 }
 0x178   : > { %v413_v30 = vrot.slane %v412_v28, 4  ;;  %v430_v31 = vrot.slane %v429_v29, 4 }
 0x17a   : > { %v414_v32 = vadd.f32 %v413_v30, %v412_v28  ;;  %v431_v33 = vadd.f32 %v430_v31, %v429_v29 }
 0x17c   : > { %v415_v34 = vrot.slane %v414_v32, 2  ;;  %v432_v35 = vrot.slane %v431_v33, 2 }
 0x17e   : > { %v416_v36 = vadd.f32 %v415_v34, %v414_v32  ;;  %v433_v37 = vadd.f32 %v432_v35, %v431_v33 }
 0x180   : > { %v417_v38 = vrot.slane %v416_v36, 1  ;;  %v434_v39 = vrot.slane %v433_v37, 1 }
 0x182   : > { %v418_v40 = vadd.f32 %v417_v38, %v416_v36  ;;  %v435_v41 = vadd.f32 %v434_v39, %v433_v37 }
 0x184   : > { %v436_v42 = vmul.f32 0.5, %v435_v41  ;;  %v419_v43 = vmul.f32 0.5, %v418_v40 }
 0x186   : > { %955 = vtanh.f32 %v436_v42 }
 0x187   : > { %957 = vtanh.f32 %v419_v43 }
 0x188   : > { %959 = vtanh.f32 %v746_v59 }
 0x189   : > { %961 = vtanh.f32 %v747_v60 }
 0x190   : > { %v956_v44 = vpop.eup %955 }
 0x191   : > { %v438_v45 = vadd.f32 1.0, %v956_v44  ;;  %v958_v46 = vpop.eup %957 }
 0x192   : > { %v421_v49 = vadd.f32 1.0, %v958_v46  ;;  %v960_v61 = vpop.eup %959 }
 0x193   : > { %v439_v48 = vmul.f32 0.5, %v438_v45  ;;  %v962_v62 = vpop.eup %961  ;;  %v750_v63 = vadd.f32 1.0, %v960_v61 }
 0x194   : > { %v422_v51 = vmul.f32 0.5, %v421_v49 }
 0x195   : > { %v443_v50 = vmul.f32 %v442_v47, %v439_v48  ;;  %v752_v1 = vmul.f32 0.5, %v750_v63 }
 0x196   : > { %v441_v53 = vmul.f32 %v440_v52, %v422_v51 }
 0x197   : > { %878 = vmatmul.mubr.msk.f32.vlgmr.msra.gmra.mrb[0].mxu0 %vm409_vm0, %v443_v50 }
 0x198   : > { %522 = vmatpush1.msra.mxu0 %v1311_v0  ;;  %585 = vmatprep.mubr.f32.mxu0 %v1096_v11  ;;  %v751_v0 = vadd.f32 1.0, %v962_v62 }
 0x19a   : > { %v753_v3 = vmul.f32 0.5, %v751_v0 }
 0x19f   : > { %879 = vmatmul.mubr.msk.f32.vlgmr.msra.gmra.mrb[0].mxu0 %vm409_vm0, %v441_v53 }
 0x272   : > { %v587_v2 = vpop.f32.mrb[0].mxu0 }
 0x273   : > { %v754_v4 = vmul.f32 %v752_v1, %v587_v2  ;;  %v589_v5 = vpop.f32.mrb[1].mxu0 }
 0x274   : > { %v755_v6 = vmul.f32 %v753_v3, %v589_v5 }
 0x275   : > { %756 = vst [vmem:[%s377_s28] sm:$0xff] %v754_v4 }
 0x276   : > { %757 = vst [vmem:[%s377_s28 + $0x8] sm:$0xff] %v755_v6 }
 0x277   : > { %1034 = shalt.err (!%p1031_p1)
}
 0x278   : > { %s1035_s26 = scalar_lea.hbm %s1351_s19, 256  ;;  %s1039_s24 = scalar_lea.hbm %s1404_s9, 512 }
 0x279   : > { %p1036_p2 = scmp.ne.s32.totalorder %s1351_s19, %s1035_s26  ;;  %p1040_p11 = scmp.lt.u32.totalorder %s1351_s19, %s1404_s9 }
 0x27a   : > { %p1041_p4 = scmp.lt.u32.totalorder %s1039_s24, %s1035_s26  ;;  %p1043_p9 = scmp.lt.u32.totalorder %s1035_s26, %s1351_s19 }
 0x27b   : > { %p1037_p7 = pnand %p1036_p2, %p1243_p8 }
 0x27c   : > { %p1042_p6 = por %p1041_p4, %p1040_p11 }
 0x27d   : > { %p1038_p3 = pneg %p1037_p7 }
 0x27e   : > { %p1044_p12 = por %p1043_p9, %p1042_p6 }
 0x280   : > { %p1045_p13 = pnand %p1044_p12, %p1038_p3 }
 0x282   : > { %1048 = shalt.err (!%p1045_p13)
}
 0x283   : > { %900 = dma.vmem_to_hbm [thread:$0]  (%p1243_p8), %s1353_s18, 256, %s1351_s19, %s759_s8  }
 0x284 PF: > { %s785_s25 = sand.u32 1, %s1079_s11   ;;  %p1423_p0 = scmp.ne.s32.totalorder %s1409_s17, 0 }
 0x285   : > { %p1424_p5 = scmp.ge.s32.totalorder %s1091_s14, 2  ;;  %s786_s10 = scalar_lea.sflag [#allocation5], %s785_s25 }
 0x287   : > { %p911_p10 = pnand %p1424_p5, %p1423_p0 }
 0x289   : > { %1074 = dma.done.wait (!%p911_p10), %s786_s10, 256  }
 0x28a   : > { %1076 = vsyncadd (!%p911_p10), %s786_s10, 4294967040  ;;  %p24_p1 = scmp.ge.s32.totalorder %s1199_s21, 4   ;;  %s1425_s11 = smov %s1083_s12 }
 0x28b   : > { %s1426_s12 = smov %s1087_s13  ;;  %s1427_s13 = smov %s1235_s27 }
 0x28c   : > { %s1428_s14 = smov %s1199_s21  ;;  %26 = sbr.rel (!%p24_p1) target bundleno = 8 (0x8), region = 108 }
 0x293   :  { %791 = vsyncpa [#allocation4], 1 }
 0x294   :  { %793 = vsyncpa [#allocation4 + $0x1], 1 }
 0x295   :  { %794 = vsyncpa [#allocation7], 1 }
 0x296   :  { %795 = vsyncpa [#allocation5], 1 }
 0x297   :  { %797 = vsyncpa [#allocation5 + $0x1], 1 }

</bundles_post_ra>
